<compile_context>
chip_gen: v6e
topology: v6e:2x2x1
jax: 0.10.0
libtpu: 0.0.40
codegen_flags: <defaults>
</compile_context>

<pallas_src>
import functools

import jax
import jax.numpy as jnp
from jax.experimental import pallas as pl
from jax.experimental.pallas import tpu as pltpu


def _round_up(n, m):
    return ((n + m - 1) // m) * m


def _dropout_keep_mask(seed_u32, row_ids_u32, col_ids_u32, keep_prob):
    """Deterministic counter-based keep mask with P(keep) == keep_prob.

    Pure jnp (murmur-style 32-bit mixer), so the exact same function is used
    inside the Pallas kernel (TPU VPU int ops, also fine in interpret mode)
    and in the pure-JAX reference check.
    """
    v = (row_ids_u32 * jnp.uint32(0x9E3779B1)
         + col_ids_u32 * jnp.uint32(0x85EBCA77)
         + seed_u32 * jnp.uint32(0x27D4EB2F))
    v = v ^ (v >> 16)
    v = v * jnp.uint32(0x7FEB352D)
    v = v ^ (v >> 15)
    v = v * jnp.uint32(0x846CA68B)
    v = v ^ (v >> 16)
    # Integer-threshold compare: no int->float convert, exact keep probability.
    threshold = jnp.uint32(int(keep_prob * 4294967296.0))
    return v < threshold


def _expert_kernel(seed_ref, x_ref, w1_ref, b1_ref, w2_ref, b2_ref, o_ref,
                   *, keep_prob: float, apply_dropout: bool, compute_dtype):
    # fc1: x @ w1 + b1  (MXU, f32 accumulation)
    x = x_ref[...].astype(compute_dtype)
    w1 = w1_ref[...].astype(compute_dtype)
    h = jnp.dot(x, w1, preferred_element_type=jnp.float32)
    h = h + b1_ref[...]                    # (1, H) broadcasts over rows

    # ReLU
    h = jnp.maximum(h, 0.0)

    # Dropout(p = 1 - keep_prob), inverted-dropout semantics like nn.Dropout.
    if apply_dropout:
        tile_rows = h.shape[0]
        row_start = pl.program_id(0) * tile_rows      # per-tile distinct masks
        rows = (jax.lax.broadcasted_iota(jnp.int32, h.shape, 0)
                + row_start).astype(jnp.uint32)
        cols = jax.lax.broadcasted_iota(jnp.int32, h.shape, 1).astype(jnp.uint32)
        keep = _dropout_keep_mask(seed_ref[0].astype(jnp.uint32),
                                  rows, cols, keep_prob)
        # Only mask here; the 1/keep_prob scale is applied to the (smaller)
        # fc2 result below (linear, so numerically identical).
        h = jnp.where(keep, h, 0.0)

    # fc2: h @ w2 (+ dropout scale) + b2
    out = jnp.dot(h.astype(compute_dtype), w2_ref[...].astype(compute_dtype),
                  preferred_element_type=jnp.float32)
    if apply_dropout:
        out = out * (1.0 / keep_prob)
    out = out + b2_ref[...]                # (1, D_out)
    o_ref[...] = out.astype(o_ref.dtype)


def expert_forward(x, w1, b1, w2, b2, *, seed=0, training=False, p=0.3,
                   block_rows=128, compute_dtype=jnp.float32):
    """Fused Expert forward.  x: [B, D_in] f32.  Returns [B, D_out] f32.

    compute_dtype=jnp.bfloat16 is recommended on v6e/v7x once shapes are large
    enough to be MXU-bound (f32 accumulation is kept either way).
    """
    B, d_in = x.shape
    h_dim = w1.shape[1]
    d_out = w2.shape[1]
    assert w1.shape == (d_in, h_dim) and w2.shape == (h_dim, d_out)
    assert b1.shape == (h_dim,) and b2.shape == (d_out,)

    # Lane-dense padding: feature dims -> multiples of 128 (unmasked vector
    # stores, better MXU fill).  Zero padding is exact for Linear/ReLU/Dropout;
    # padded rows/cols are sliced off at the end.
    d_in_p = _round_up(d_in, 128)
    h_p = _round_up(h_dim, 128)
    d_out_p = _round_up(d_out, 128)
    tm = min(block_rows, _round_up(B, 8))
    B_p = _round_up(B, tm)

    x_p = jnp.pad(x, ((0, B_p - B), (0, d_in_p - d_in)))
    w1_p = jnp.pad(w1, ((0, d_in_p - d_in), (0, h_p - h_dim)))
    b1_p = jnp.pad(b1, (0, h_p - h_dim)).reshape(1, h_p)
    w2_p = jnp.pad(w2, ((0, h_p - h_dim), (0, d_out_p - d_out)))
    b2_p = jnp.pad(b2, (0, d_out_p - d_out)).reshape(1, d_out_p)

    seed_arr = jnp.asarray([seed], dtype=jnp.int32)
    kernel = functools.partial(
        _expert_kernel,
        keep_prob=float(1.0 - p),
        apply_dropout=bool(training and p > 0.0),
        compute_dtype=compute_dtype,
    )

    grid = (B_p // tm,)
    out_p = pl.pallas_call(
        kernel,
        out_shape=jax.ShapeDtypeStruct((B_p, d_out_p), jnp.float32),
        grid_spec=pltpu.PrefetchScalarGridSpec(
            num_scalar_prefetch=1,                     # seed lands in SMEM
            grid=grid,
            in_specs=[
                # x: tiled over batch rows -> pipelined / double-buffered.
                pl.BlockSpec((tm, d_in_p), lambda i, seed: (i, 0)),
                # Weights / biases: resident (same block every grid step).
                pl.BlockSpec((d_in_p, h_p), lambda i, seed: (0, 0)),
                pl.BlockSpec((1, h_p), lambda i, seed: (0, 0)),
                pl.BlockSpec((h_p, d_out_p), lambda i, seed: (0, 0)),
                pl.BlockSpec((1, d_out_p), lambda i, seed: (0, 0)),
            ],
            out_specs=pl.BlockSpec((tm, d_out_p), lambda i, seed: (i, 0)),
        ),
        compiler_params=pltpu.CompilerParams(
            # Batch tiles are independent -> megacore-shardable on v7x.
            dimension_semantics=("parallel",),
        ),
    )(seed_arr, x_p, w1_p, b1_p, w2_p, b2_p)

    # TODO(synk): for very large experts (w1/w2 tens of MiB; v7x has only
    # 64 MiB VMEM) add a trailing "arbitrary" grid axis tiling the hidden dim
    # with a VMEM f32 accumulator + pl.when init/finalize instead of keeping
    # both weights resident, and set vmem_limit_bytes accordingly.
    return out_p[:B, :d_out]


if __name__ == "__main__":
    # Small shapes consistent with Expert(input_feature_size, hidden, output).
    B = 8
    input_feature_size = 32
    expert_hidden_size = 64
    expert_output_size = 16

    key = jax.random.PRNGKey(0)
    kx, k1, kb1, k2, kb2 = jax.random.split(key, 5)

    x = jax.random.normal(kx, (B, input_feature_size), dtype=jnp.float32)

    bound1 = 1.0 / (input_feature_size ** 0.5)
    w1 = jax.random.uniform(k1, (input_feature_size, expert_hidden_size),
                            minval=-bound1, maxval=bound1, dtype=jnp.float32)
    b1 = jax.random.uniform(kb1, (expert_hidden_size,),
                            minval=-bound1, maxval=bound1, dtype=jnp.float32)

    bound2 = 1.0 / (expert_hidden_size ** 0.5)
    w2 = jax.random.uniform(k2, (expert_hidden_size, expert_output_size),
                            minval=-bound2, maxval=bound2, dtype=jnp.float32)
    b2 = jax.random.uniform(kb2, (expert_output_size,),
                            minval=-bound2, maxval=bound2, dtype=jnp.float32)

    # --- Eval mode: dropout is identity -> compare to pure-JAX reference.
    out_eval = expert_forward(x, w1, b1, w2, b2, training=False)
    out_eval = jax.block_until_ready(out_eval)
    ref_eval = jnp.maximum(x @ w1 + b1, 0.0) @ w2 + b2
    assert out_eval.shape == (B, expert_output_size)
    assert jnp.allclose(out_eval, ref_eval, atol=1e-5, rtol=1e-5), \
        "eval-mode mismatch vs reference"

    # --- Training mode: the dropout mask is a deterministic hash -> rebuild
    # the same mask in pure JAX and compare exactly the same math.
    seed = 123
    p = 0.3
    out_train = expert_forward(x, w1, b1, w2, b2, seed=seed, training=True, p=p)
    out_train = jax.block_until_ready(out_train)

    h_ref = jnp.maximum(x @ w1 + b1, 0.0)
    rows = jnp.broadcast_to(
        jnp.arange(B, dtype=jnp.int32)[:, None], h_ref.shape).astype(jnp.uint32)
    cols = jnp.broadcast_to(
        jnp.arange(expert_hidden_size, dtype=jnp.int32)[None, :],
        h_ref.shape).astype(jnp.uint32)
    keep = _dropout_keep_mask(jnp.uint32(seed), rows, cols, 1.0 - p)
    ref_train = (jnp.where(keep, h_ref, 0.0) @ w2) * (1.0 / (1.0 - p)) + b2
    assert out_train.shape == (B, expert_output_size)
    assert jnp.allclose(out_train, ref_train, atol=1e-5, rtol=1e-5), \
        "training-mode mismatch vs reference"

    print("KERNEL_OK")
</pallas_src>

<mosaic_0001>
module attributes {stable_mosaic.version = 11 : i64} {
  func.func @_expert_kernel(%arg0: i32, %arg1: memref<1xi32, #tpu.memory_space<smem>>, %arg2: memref<8x128xf32, #tpu.memory_space<vmem>>, %arg3: memref<128x128xf32, #tpu.memory_space<vmem>>, %arg4: memref<1x128xf32, #tpu.memory_space<vmem>>, %arg5: memref<128x128xf32, #tpu.memory_space<vmem>>, %arg6: memref<1x128xf32, #tpu.memory_space<vmem>>, %arg7: memref<8x128xf32, #tpu.memory_space<vmem>>) attributes {dimension_semantics = [#tpu.dimension_semantics<parallel>], iteration_bounds = array<i64: 1>, scalar_prefetch = 1 : i64, scratch_operands = 0 : i64, tpu.core_type = #tpu.core_type<tc>, window_params = [{transform_indices = @transform_0, window_bounds = array<i64: 8, 128>}, {pipeline_mode = #tpu.pipeline_mode<synchronous>, transform_indices = @transform_1, window_bounds = array<i64: 128, 128>}, {pipeline_mode = #tpu.pipeline_mode<synchronous>, transform_indices = @transform_2, window_bounds = array<i64: 1, 128>}, {pipeline_mode = #tpu.pipeline_mode<synchronous>, transform_indices = @transform_3, window_bounds = array<i64: 128, 128>}, {pipeline_mode = #tpu.pipeline_mode<synchronous>, transform_indices = @transform_4, window_bounds = array<i64: 1, 128>}, {transform_indices = @transform_5, window_bounds = array<i64: 8, 128>}]} {
    %c0 = arith.constant 0 : index
    %c0_0 = arith.constant 0 : index
    %0 = vector.load %arg2[%c0, %c0_0] : memref<8x128xf32, #tpu.memory_space<vmem>>, vector<8x128xf32>
    %c0_1 = arith.constant 0 : index
    %c0_2 = arith.constant 0 : index
    %1 = vector.load %arg3[%c0_1, %c0_2] : memref<128x128xf32, #tpu.memory_space<vmem>>, vector<128x128xf32>
    %cst = arith.constant dense<0.000000e+00> : vector<8x128xf32>
    %2 = tpu.matmul %0, %1, %cst {dimension_numbers = #tpu.dot_dimension_numbers<[1], [0], [0], [1], [0, 0, 1, 1], [], []>} : vector<8x128xf32>, vector<128x128xf32>, vector<8x128xf32> -> vector<8x128xf32>
    %c0_3 = arith.constant 0 : index
    %c0_4 = arith.constant 0 : index
    %3 = vector.load %arg4[%c0_3, %c0_4] : memref<1x128xf32, #tpu.memory_space<vmem>>, vector<1x128xf32>
    %4 = vector.broadcast %3 : vector<1x128xf32> to vector<8x128xf32>
    %5 = arith.addf %2, %4 : vector<8x128xf32>
    %cst_5 = arith.constant 0.000000e+00 : f32
    %6 = vector.broadcast %cst_5 : f32 to vector<8x128xf32>
    %7 = arith.maximumf %5, %6 : vector<8x128xf32>
    %c0_6 = arith.constant 0 : index
    %c0_7 = arith.constant 0 : index
    %8 = vector.load %arg5[%c0_6, %c0_7] : memref<128x128xf32, #tpu.memory_space<vmem>>, vector<128x128xf32>
    %cst_8 = arith.constant dense<0.000000e+00> : vector<8x128xf32>
    %9 = tpu.matmul %7, %8, %cst_8 {dimension_numbers = #tpu.dot_dimension_numbers<[1], [0], [0], [1], [0, 0, 1, 1], [], []>} : vector<8x128xf32>, vector<128x128xf32>, vector<8x128xf32> -> vector<8x128xf32>
    %c0_9 = arith.constant 0 : index
    %c0_10 = arith.constant 0 : index
    %10 = vector.load %arg6[%c0_9, %c0_10] : memref<1x128xf32, #tpu.memory_space<vmem>>, vector<1x128xf32>
    %11 = vector.broadcast %10 : vector<1x128xf32> to vector<8x128xf32>
    %12 = arith.addf %9, %11 : vector<8x128xf32>
    %c0_11 = arith.constant 0 : index
    %c0_12 = arith.constant 0 : index
    %13 = vector.load %arg7[%c0_11, %c0_12] : memref<8x128xf32, #tpu.memory_space<vmem>>, vector<8x128xf32>
    tpu.vector_store %arg7[%c0_11, %c0_12], %12 {strides = array<i32>} : memref<8x128xf32, #tpu.memory_space<vmem>>, vector<8x128xf32>,
    return
  }
  func.func @transform_0(%arg0: i32, %arg1: memref<1xi32, #tpu.memory_space<smem>>) -> (i32, i32) {
    %c0_i32 = arith.constant 0 : i32
    %c0_i32_0 = arith.constant 0 : i32
    return %arg0, %c0_i32 : i32, i32
  }
  func.func @transform_1(%arg0: i32, %arg1: memref<1xi32, #tpu.memory_space<smem>>) -> (i32, i32) {
    %c0_i32 = arith.constant 0 : i32
    %c0_i32_0 = arith.constant 0 : i32
    %c0_i32_1 = arith.constant 0 : i32
    return %c0_i32, %c0_i32_0 : i32, i32
  }
  func.func @transform_2(%arg0: i32, %arg1: memref<1xi32, #tpu.memory_space<smem>>) -> (i32, i32) {
    %c0_i32 = arith.constant 0 : i32
    %c0_i32_0 = arith.constant 0 : i32
    %c0_i32_1 = arith.constant 0 : i32
    return %c0_i32, %c0_i32_0 : i32, i32
  }
  func.func @transform_3(%arg0: i32, %arg1: memref<1xi32, #tpu.memory_space<smem>>) -> (i32, i32) {
    %c0_i32 = arith.constant 0 : i32
    %c0_i32_0 = arith.constant 0 : i32
    %c0_i32_1 = arith.constant 0 : i32
    return %c0_i32, %c0_i32_0 : i32, i32
  }
  func.func @transform_4(%arg0: i32, %arg1: memref<1xi32, #tpu.memory_space<smem>>) -> (i32, i32) {
    %c0_i32 = arith.constant 0 : i32
    %c0_i32_0 = arith.constant 0 : i32
    %c0_i32_1 = arith.constant 0 : i32
    return %c0_i32, %c0_i32_0 : i32, i32
  }
  func.func @transform_5(%arg0: i32, %arg1: memref<1xi32, #tpu.memory_space<smem>>) -> (i32, i32) {
    %c0_i32 = arith.constant 0 : i32
    %c0_i32_0 = arith.constant 0 : i32
    return %arg0, %c0_i32 : i32, i32
  }
}

</mosaic_0001>

<bundles_post_ra>
// kernel: tpu_custom_call.1
= control target key start
LH: loop header
LB: loop body
LE: loop exit
PB: predicated region body
PF: predicated region fallthrough
CT: control target
= control target key end

     0   :  { %12 = vsyncpa [#allocation5], 0  ;;  %s562_s0 = inlined_call_operand.<no memory space> [shape: s32[1], index: 0, kind: input, shape index: {}]   ;;  %s563_s1 = inlined_call_operand.hbm [shape: f32[8,128], index: 1, kind: input, shape index: {}]   ;;  %s564_s2 = inlined_call_operand.hbm [shape: f32[128,128], index: 2, kind: input, shape index: {}]   ;;  %s565_s3 = inlined_call_operand.vmem [shape: f32[1,128], index: 3, kind: input, shape index: {}]   ;;  %s566_s4 = inlined_call_operand.hbm [shape: f32[128,128], index: 4, kind: input, shape index: {}]   ;;  %s567_s5 = inlined_call_operand.vmem [shape: f32[1,128], index: 5, kind: input, shape index: {}]   ;;  %s568_s6 = inlined_call_operand.hbm [shape: f32[8,128], index: 6, kind: output, shape index: {}]  }
   0x1   :  { %13 = vsyncpa [#allocation8], 0 }
   0x2   :  { %14 = vsyncpa [#allocation6], 0  ;;  %s467_s0 = smov [#allocation7]  }
   0x3   :  { %s30_s21 = sshll.u32 %s467_s0, 4  ;;  %s31_s21 = int_to_ptr.vmem [resolvable:$true] %s30_s21 }
   0x4   :  { %s389_s22 = scalar_lea.vmem %s31_s21, 2048  ;;  %p394_p1 = scmp.lt.s32.totalorder %s31_s21, %s31_s21 }
   0x5   :  { %p390_p0 = scmp.ne.s32.totalorder %s31_s21, %s389_s22  ;;  %p395_p2 = scmp.lt.s32.totalorder %s389_s22, %s389_s22 }
   0x7   :  { %p396_p3 = por %p395_p2, %p394_p1 }
   0x9   :  { %p397_p4 = pnand %p396_p3, %p390_p0 }
   0xb   :  { %400 = shalt.err (!%p397_p4)
}
   0xc   :  { %s468_s23 = smov 128   ;;  %s469_s24 = smov 8  }
   0xd   :  { %36 = dma.hbm_to_vmem [thread:$0]  %s564_s2, 2048, %s31_s21, [#allocation8], %s468_s23, %s468_s23, %s469_s24  }
   0xe   :  { %s470_s27 = smov [#allocation4]   ;;  %s471_s29 = smov [#allocation9]  }
   0xf   :  { %s21_s28 = sshll.u32 %s470_s27, 4  ;;  %s44_s30 = sshll.u32 %s471_s29, 4  ;;  %s22_s28 = int_to_ptr.vmem [resolvable:$true] %s21_s28  ;;  %s45_s30 = int_to_ptr.vmem [resolvable:$true] %s44_s30 }
  0x10   :  { %s409_s7 = scalar_lea.vmem %s22_s28, 128  ;;  %p414_p6 = scmp.lt.s32.totalorder %s22_s28, %s22_s28 }
  0x11   :  { %p410_p5 = scmp.ne.s32.totalorder %s22_s28, %s409_s7  ;;  %p415_p7 = scmp.lt.s32.totalorder %s409_s7, %s409_s7 }
  0x13   :  { %p416_p8 = por %p415_p7, %p414_p6 }
  0x15   :  { %p417_p9 = pnand %p416_p8, %p410_p5 }
  0x17   :  { %420 = shalt.err (!%p417_p9)
}
  0x18   :  { %24 = dma.hbm_to_vmem [thread:$0]  %s563_s1, 128, %s22_s28, [#allocation5]  }
  0x19   :  { %s429_s10 = scalar_lea.vmem %s45_s30, 2048  ;;  %p434_p11 = scmp.lt.s32.totalorder %s45_s30, %s45_s30 }
  0x1a   :  { %p430_p10 = scmp.ne.s32.totalorder %s45_s30, %s429_s10  ;;  %p435_p12 = scmp.lt.s32.totalorder %s429_s10, %s429_s10 }
  0x1c   :  { %p436_p13 = por %p435_p12, %p434_p11 }
  0x1e   :  { %p437_p0 = pnand %p436_p13, %p430_p10 }
  0x20   :  { %440 = shalt.err (!%p437_p0)
}
  0x21   :  { %50 = dma.hbm_to_vmem [thread:$0]  %s566_s4, 2048, %s45_s30, [#allocation8], %s468_s23, %s468_s23, %s469_s24  }
  0x22   :  { %461 = dma.done.wait [#allocation5], 128  }
  0x23   :  { %462 = vsyncadd [#allocation5], 4294967168 }
  0x24   :  { %463 = dma.done.wait [#allocation8], 4096  }
  0x25   :  { %464 = vsyncadd [#allocation8], 4294963200  ;;  %v472_v0 = vmov 0.0   ;;  %vm473_vm0 = vmmov 0   ;;  %v78_v1 = vld [vmem:[#allocation7 + $0x78] sm:$0xff]  ;;  %v77_v2 = vld [vmem:[#allocation7 + $0x70] sm:$0xff] }
  0x26   :  { %303 = vmatprep.subr.mxu0 %v472_v0  ;;  %335 = vmatprep.mubr.msk.f32.mxu0 %vm473_vm0, %v472_v0  ;;  %v76_v3 = vld [vmem:[#allocation7 + $0x68] sm:$0xff]  ;;  %v75_v4 = vld [vmem:[#allocation7 + $0x60] sm:$0xff]  ;;  %v172_v5 = vld [vmem:[#allocation9 + $0x78] sm:$0xff]  ;;  %s474_s14 = smov [#allocation10]  }
  0x27   :  { %338 = vmatprep.subr.mxu1 %v472_v0  ;;  %370 = vmatprep.mubr.msk.f32.mxu1 %vm473_vm0, %v472_v0  ;;  %v74_v6 = vld [vmem:[#allocation7 + $0x58] sm:$0xff]  ;;  %v171_v7 = vld [vmem:[#allocation9 + $0x70] sm:$0xff]  ;;  %v170_v8 = vld [vmem:[#allocation9 + $0x68] sm:$0xff]  ;;  %s257_s15 = sshll.u32 %s474_s14, 4  ;;  %s258_s15 = int_to_ptr.vmem [resolvable:$true] %s257_s15 }
  0x28   :  { %304 = vmatpush3.msra.mxu0 %v78_v1  ;;  %339 = vmatpush3.msra.mxu1 %v172_v5  ;;  %v73_v9 = vld [vmem:[#allocation7 + $0x50] sm:$0xff]  ;;  %v169_v10 = vld [vmem:[#allocation9 + $0x60] sm:$0xff]  ;;  %v72_v11 = vld [vmem:[#allocation7 + $0x48] sm:$0xff]  ;;  %s441_s16 = scalar_lea.vmem %s258_s15, 128  ;;  %p446_p2 = scmp.lt.s32.totalorder %s258_s15, %s258_s15 }
  0x29   :  { %305 = vmatprep.subr.mxu0 %v472_v0  ;;  %340 = vmatprep.subr.mxu1 %v472_v0  ;;  %v168_v12 = vld [vmem:[#allocation9 + $0x58] sm:$0xff]  ;;  %v71_v13 = vld [vmem:[#allocation7 + $0x40] sm:$0xff]  ;;  %v167_v14 = vld [vmem:[#allocation9 + $0x50] sm:$0xff]  ;;  %p442_p1 = scmp.ne.s32.totalorder %s258_s15, %s441_s16  ;;  %p447_p3 = scmp.lt.s32.totalorder %s441_s16, %s441_s16 }
  0x2a   :  { %306 = vmatpush3.msra.mxu0 %v77_v2  ;;  %341 = vmatpush3.msra.mxu1 %v171_v7  ;;  %v70_v15 = vld [vmem:[#allocation7 + $0x38] sm:$0xff]  ;;  %v166_v16 = vld [vmem:[#allocation9 + $0x48] sm:$0xff]  ;;  %v69_v17 = vld [vmem:[#allocation7 + $0x30] sm:$0xff] }
  0x2b   :  { %307 = vmatprep.subr.mxu0 %v472_v0  ;;  %342 = vmatprep.subr.mxu1 %v472_v0  ;;  %v165_v18 = vld [vmem:[#allocation9 + $0x40] sm:$0xff]  ;;  %v68_v19 = vld [vmem:[#allocation7 + $0x28] sm:$0xff]  ;;  %v164_v20 = vld [vmem:[#allocation9 + $0x38] sm:$0xff]  ;;  %p448_p4 = por %p447_p3, %p446_p2 }
  0x2c   :  { %308 = vmatpush3.msra.mxu0 %v76_v3  ;;  %343 = vmatpush3.msra.mxu1 %v170_v8  ;;  %v67_v21 = vld [vmem:[#allocation7 + $0x20] sm:$0xff]  ;;  %v163_v22 = vld [vmem:[#allocation9 + $0x30] sm:$0xff]  ;;  %v66_v23 = vld [vmem:[#allocation7 + $0x18] sm:$0xff] }
  0x2d   :  { %309 = vmatprep.subr.mxu0 %v472_v0  ;;  %344 = vmatprep.subr.mxu1 %v472_v0  ;;  %v162_v24 = vld [vmem:[#allocation9 + $0x28] sm:$0xff]  ;;  %v65_v25 = vld [vmem:[#allocation7 + $0x10] sm:$0xff]  ;;  %v161_v26 = vld [vmem:[#allocation9 + $0x20] sm:$0xff]  ;;  %p449_p5 = pnand %p448_p4, %p442_p1 }
  0x2e   :  { %310 = vmatpush3.msra.mxu0 %v75_v4  ;;  %345 = vmatpush3.msra.mxu1 %v169_v10  ;;  %v64_v27 = vld [vmem:[#allocation7 + $0x8] sm:$0xff]  ;;  %v160_v28 = vld [vmem:[#allocation9 + $0x18] sm:$0xff]  ;;  %v63_v29 = vld [vmem:[#allocation7] sm:$0xff] }
  0x2f   :  { %311 = vmatprep.subr.mxu0 %v472_v0  ;;  %346 = vmatprep.subr.mxu1 %v472_v0  ;;  %v62_v30 = vld [vmem:[#allocation4] sm:$0xff]  ;;  %v159_v31 = vld [vmem:[#allocation9 + $0x10] sm:$0xff]  ;;  %v158_v32 = vld [vmem:[#allocation9 + $0x8] sm:$0xff] }
  0x30   :  { %312 = vmatpush3.msra.mxu0 %v74_v6  ;;  %347 = vmatpush3.msra.mxu1 %v168_v12  ;;  %v157_v33 = vld [vmem:[#allocation9] sm:$0xff]  ;;  %v267_v34 = vld [vmem:[%s565_s3] ss:$0 sm:$0xff] }
  0x31   :  { %313 = vmatprep.subr.mxu0 %v472_v0  ;;  %348 = vmatprep.subr.mxu1 %v472_v0  ;;  %v268_v39 = vld [vmem:[%s567_s5] ss:$0 sm:$0xff] }
  0x32   :  { %314 = vmatpush3.msra.mxu0 %v73_v9  ;;  %349 = vmatpush3.msra.mxu1 %v167_v14 }
  0x33   :  { %315 = vmatprep.subr.mxu0 %v472_v0  ;;  %350 = vmatprep.subr.mxu1 %v472_v0 }
  0x34   :  { %316 = vmatpush3.msra.mxu0 %v72_v11  ;;  %351 = vmatpush3.msra.mxu1 %v166_v16 }
  0x35   :  { %317 = vmatprep.subr.mxu0 %v472_v0  ;;  %352 = vmatprep.subr.mxu1 %v472_v0 }
  0x36   :  { %318 = vmatpush3.msra.mxu0 %v71_v13  ;;  %353 = vmatpush3.msra.mxu1 %v165_v18 }
  0x37   :  { %319 = vmatprep.subr.mxu0 %v472_v0  ;;  %354 = vmatprep.subr.mxu1 %v472_v0 }
  0x38   :  { %320 = vmatpush3.msra.mxu0 %v70_v15  ;;  %355 = vmatpush3.msra.mxu1 %v164_v20 }
  0x39   :  { %321 = vmatprep.subr.mxu0 %v472_v0  ;;  %356 = vmatprep.subr.mxu1 %v472_v0 }
  0x3a   :  { %322 = vmatpush3.msra.mxu0 %v69_v17  ;;  %357 = vmatpush3.msra.mxu1 %v163_v22 }
  0x3b   :  { %323 = vmatprep.subr.mxu0 %v472_v0  ;;  %358 = vmatprep.subr.mxu1 %v472_v0 }
  0x3c   :  { %324 = vmatpush3.msra.mxu0 %v68_v19  ;;  %359 = vmatpush3.msra.mxu1 %v162_v24 }
  0x3d   :  { %325 = vmatprep.subr.mxu0 %v472_v0  ;;  %360 = vmatprep.subr.mxu1 %v472_v0 }
  0x3e   :  { %326 = vmatpush3.msra.mxu0 %v67_v21  ;;  %361 = vmatpush3.msra.mxu1 %v161_v26 }
  0x3f   :  { %327 = vmatprep.subr.mxu0 %v472_v0  ;;  %362 = vmatprep.subr.mxu1 %v472_v0 }
  0x40   :  { %328 = vmatpush3.msra.mxu0 %v66_v23  ;;  %363 = vmatpush3.msra.mxu1 %v160_v28 }
  0x41   :  { %329 = vmatprep.subr.mxu0 %v472_v0  ;;  %364 = vmatprep.subr.mxu1 %v472_v0 }
  0x42   :  { %330 = vmatpush3.msra.mxu0 %v65_v25  ;;  %365 = vmatpush3.msra.mxu1 %v159_v31 }
  0x43   :  { %331 = vmatprep.subr.mxu0 %v472_v0  ;;  %366 = vmatprep.subr.mxu1 %v472_v0 }
  0x44   :  { %332 = vmatpush3.msra.mxu0 %v64_v27  ;;  %367 = vmatpush3.msra.mxu1 %v158_v32 }
  0x45   :  { %333 = vmatprep.subr.mxu0 %v472_v0  ;;  %368 = vmatprep.subr.mxu1 %v472_v0 }
  0x46   :  { %334 = vmatpush3.msra.mxu0 %v63_v29  ;;  %369 = vmatpush3.msra.mxu1 %v157_v33 }
  0x47   :  { %336 = vmatmul.mubr.f32.vlgmr.msra.gmra.mxu0 %v62_v30 }
 0x107   :  { %v152_v35 = vpop.f32.mrf.mxu0 }
 0x108   :  { %v153_v36 = vadd.f32 %v267_v34, %v152_v35 }
 0x109   :  { %v337_v37 = vpop.f32.mrf.mxu0 }
 0x10a   :  { %v156_v38 = vmax.f32 %v153_v36, 0.0 }
 0x10c   :  { %371 = vmatmul.mubr.f32.vlgmr.msra.gmra.mxu1 %v156_v38 }
 0x1cc   :  { %v246_v40 = vpop.f32.mrf.mxu1 }
 0x1cd   :  { %v247_v41 = vadd.f32 %v268_v39, %v246_v40 }
 0x1ce   :  { %v372_v42 = vpop.f32.mrf.mxu1 }
 0x1cf   :  { %250 = vst [vmem:[#allocation10] sm:$0xff] %v247_v41 }
 0x1d0   :  { %452 = shalt.err (!%p449_p5)
}
 0x1d1   :  { %260 = dma.vmem_to_hbm [thread:$0]  %s258_s15, 128, %s568_s6, [#allocation6]  }
 0x1d2   :  { %465 = dma.done.wait [#allocation6], 128  }
 0x1d3   :  { %466 = vsyncadd [#allocation6], 4294967168 }
 0x1d4   :  { %264 = vsyncpa [#allocation5], 1 }
 0x1d5   :  { %265 = vsyncpa [#allocation8], 1 }
 0x1d6   :  { %266 = vsyncpa [#allocation6], 1 }

</bundles_post_ra>
